<compile_context>
chip_gen: v6e
topology: v6e:2x2x1
jax: 0.10.0
libtpu: 0.0.40
codegen_flags: <defaults>
</compile_context>

<pallas_src>
import jax
import jax.numpy as jnp
from jax.experimental import pallas as pl
from jax.experimental.pallas import tpu as pltpu


def _round_up(x, m):
    return ((x + m - 1) // m) * m


def _make_kernel(action_dim, vpu_action):
    def kernel(obs_ref, act_ref, w1o_ref, w1a_ref, b1_ref,
               w2_ref, b2_ref, w3_ref, b3_ref, o_ref):
        wdt = w1o_ref.dtype
        # Layer 1: split matmul replaces torch.cat([obs, action], dim=1) @ W1.T
        # Activations are cast to the weight dtype in-register (free on VPU);
        # accumulation and bias/ReLU are f32.
        h1 = jnp.dot(obs_ref[...].astype(wdt), w1o_ref[...],
                     preferred_element_type=jnp.float32)
        if vpu_action:
            # K = action_dim (1-4): do it on the VPU as an outer-product
            # accumulate and keep the MXU free.
            act = act_ref[...].astype(jnp.float32)
            w1a = w1a_ref[...].astype(jnp.float32)
            for j in range(action_dim):
                h1 = h1 + act[:, j:j + 1] * w1a[j:j + 1, :]
        else:
            h1 = h1 + jnp.dot(act_ref[...].astype(wdt), w1a_ref[...],
                              preferred_element_type=jnp.float32)
        h1 = jnp.maximum(h1 + b1_ref[...], 0.0)

        h2 = jnp.dot(h1.astype(w2_ref.dtype), w2_ref[...],
                     preferred_element_type=jnp.float32)
        h2 = jnp.maximum(h2 + b2_ref[...], 0.0)

        out = jnp.dot(h2.astype(w3_ref.dtype), w3_ref[...],
                      preferred_element_type=jnp.float32)
        o_ref[...] = (out + b3_ref[...]).astype(o_ref.dtype)
    return kernel


def init_params(key, obs_dim, action_dim, hidden_dim, n_quantiles):
    """PyTorch nn.Linear-style init. Weights stored transposed: [in, out]."""
    dims = [(obs_dim + action_dim, hidden_dim),
            (hidden_dim, hidden_dim),
            (hidden_dim, n_quantiles)]
    params = {}
    for i, (fan_in, fan_out) in enumerate(dims, start=1):
        key, kw, kb = jax.random.split(key, 3)
        bound = 1.0 / jnp.sqrt(float(fan_in))
        params[f"w{i}"] = jax.random.uniform(
            kw, (fan_in, fan_out), jnp.float32, -bound, bound)
        params[f"b{i}"] = jax.random.uniform(
            kb, (1, fan_out), jnp.float32, -bound, bound)
    return params


def prepare_params(params, obs_dim, action_dim, *,
                   compute_dtype=jnp.bfloat16, lane=128):
    """One-time preprocessing:
      * split W1 by input source (obs / action) -> no runtime concat,
      * zero-pad the hidden dim to a multiple of 128 (lane-dense intermediates;
        padded columns stay exactly 0 through bias+ReLU),
      * keep the quantile output dim UNPADDED (slims the dominant HBM
        writeback stream),
      * weights in compute_dtype (bf16 default: full-rate MXU, half the DMA),
        biases kept f32 (they add straight into the f32 accumulator).
    """
    w1, b1 = params["w1"], params["b1"]
    w2, b2 = params["w2"], params["b2"]
    w3, b3 = params["w3"], params["b3"]
    hidden = w1.shape[1]
    hp = _round_up(hidden, lane)

    def pad2(a, rows, cols):
        return jnp.pad(a, ((0, rows - a.shape[0]), (0, cols - a.shape[1])))

    prepared = {
        "w1o": pad2(w1[:obs_dim], obs_dim, hp).astype(compute_dtype),
        "w1a": pad2(w1[obs_dim:obs_dim + action_dim],
                    action_dim, hp).astype(compute_dtype),
        "b1": pad2(b1, 1, hp).astype(jnp.float32),
        "w2": pad2(w2, hp, hp).astype(compute_dtype),
        "b2": pad2(b2, 1, hp).astype(jnp.float32),
        "w3": pad2(w3, hp, w3.shape[1]).astype(compute_dtype),  # cols unpadded
        "b3": b3.astype(jnp.float32),
    }
    return prepared


def quantile_q_forward(obs, action, prepared, *, block_b=2048,
                       use_vpu_action=None):
    """Pallas QuantileQFunction.forward.

    obs:      [B, obs_dim]
    action:   [B] or [B, action_dim]
    prepared: output of prepare_params
    returns   [B, n_quantiles] float32
    """
    assert obs.shape[0] == action.shape[0]
    if action.ndim == 1:
        action = action[:, None]  # unsqueeze(-1)

    w1o, w1a, b1 = prepared["w1o"], prepared["w1a"], prepared["b1"]
    w2, b2 = prepared["w2"], prepared["b2"]
    w3, b3 = prepared["w3"], prepared["b3"]

    B, obs_dim = obs.shape
    action_dim = action.shape[1]
    hp = w2.shape[1]
    nq = w3.shape[1]
    if use_vpu_action is None:
        use_vpu_action = action_dim <= 4

    # --- Batch tiling ------------------------------------------------------
    # 16-row alignment (packed bf16 sublanes on v5e); big default tile so the
    # ~0.35us per-step pipeline overhead is amortized; always >= 2 grid steps
    # when the batch allows it so both v7x TensorCores get work.
    align = 16
    bp = _round_up(B, align)
    tile_b = max(align, _round_up(min(block_b, bp), align))
    if pl.cdiv(bp, tile_b) < 2 and bp >= 2 * align:
        tile_b = _round_up(pl.cdiv(bp, 2), align)
    bp = _round_up(bp, tile_b)
    num_tiles = bp // tile_b

    # No pre-cast of activations (kernel casts in-register); pad rows only if
    # the batch is not tile-aligned.
    obs_p, act_p = obs, action
    if bp != B:
        obs_p = jnp.pad(obs_p, ((0, bp - B), (0, 0)))
        act_p = jnp.pad(act_p, ((0, bp - B), (0, 0)))

    # --- VMEM budgeting ----------------------------------------------------
    weights = (w1o, w1a, b1, w2, b2, w3, b3)
    weight_bytes = sum(int(v.size) * v.dtype.itemsize for v in weights)
    single_buffer_weights = weight_bytes > (4 << 20)  # constant block index
    in_itemsize = jnp.dtype(obs_p.dtype).itemsize
    needed = ((1 if single_buffer_weights else 2) * weight_bytes
              + 2 * tile_b * (obs_dim + action_dim) * in_itemsize
              + 2 * tile_b * nq * 4
              + 4 * tile_b * hp * 4)  # f32 h1/h2 intermediates + slack
    vmem_limit = int(min(100 * 2**20, max(32 * 2**20, int(needed * 1.25))))

    row_map = lambda i: (i, 0)
    const_map = lambda i: (0, 0)

    def wspec(arr):
        if single_buffer_weights:
            return pl.BlockSpec(arr.shape, const_map,
                                pipeline_mode=pl.Buffered(1))
        return pl.BlockSpec(arr.shape, const_map)

    flops = 2 * bp * (obs_dim * hp + action_dim * hp + hp * hp + hp * nq)
    bytes_accessed = (bp * (obs_dim + action_dim) * in_itemsize
                      + weight_bytes
                      + bp * nq * 4)

    out = pl.pallas_call(
        _make_kernel(action_dim, use_vpu_action),
        out_shape=jax.ShapeDtypeStruct((bp, nq), jnp.float32),
        grid=(num_tiles,),
        in_specs=[
            pl.BlockSpec((tile_b, obs_dim), row_map),
            pl.BlockSpec((tile_b, action_dim), row_map),
            wspec(w1o), wspec(w1a), wspec(b1),
            wspec(w2), wspec(b2),
            wspec(w3), wspec(b3),
        ],
        out_specs=pl.BlockSpec((tile_b, nq), row_map),
        compiler_params=pltpu.CompilerParams(
            dimension_semantics=("parallel",),
            vmem_limit_bytes=vmem_limit),
        cost_estimate=pl.CostEstimate(
            flops=flops, transcendentals=0, bytes_accessed=bytes_accessed),
    )(obs_p, act_p, w1o, w1a, b1, w2, b2, w3, b3)

    return out[:B] if bp != B else out


def _ref_forward(obs, action, params):
    if action.ndim == 1:
        action = action[:, None]
    oa = jnp.concatenate([obs, action], axis=1)
    hi = jax.lax.Precision.HIGHEST
    h = jnp.maximum(jnp.dot(oa, params["w1"], precision=hi) + params["b1"], 0.0)
    h = jnp.maximum(jnp.dot(h, params["w2"], precision=hi) + params["b2"], 0.0)
    return jnp.dot(h, params["w3"], precision=hi) + params["b3"]


if __name__ == "__main__":
    B, obs_dim, action_dim, hidden_dim, n_quantiles = 8, 32, 4, 64, 16

    key = jax.random.PRNGKey(0)
    k_obs, k_act, k_params, k_rest = jax.random.split(key, 4)
    obs = jax.random.normal(k_obs, (B, obs_dim), jnp.float32)
    action = jax.random.normal(k_act, (B, action_dim), jnp.float32)
    params = init_params(k_params, obs_dim, action_dim, hidden_dim, n_quantiles)
    ref = _ref_forward(obs, action, params)

    # f32 weight path (tightest match to the PyTorch module's math).
    prep_f32 = prepare_params(params, obs_dim, action_dim,
                              compute_dtype=jnp.float32)
    out = quantile_q_forward(obs, action, prep_f32)
    jax.block_until_ready(out)
    assert out.shape == (B, n_quantiles)
    assert jnp.allclose(out, ref, atol=5e-2, rtol=5e-2), \
        float(jnp.max(jnp.abs(out - ref)))

    # Multi-tile path: batch not a multiple of the tile (exercises row padding
    # and the pipelined batch grid with >= 2 steps).
    B2 = 300
    k_o2, k_a2 = jax.random.split(jax.random.PRNGKey(1))
    obs2 = jax.random.normal(k_o2, (B2, obs_dim), jnp.float32)
    act2 = jax.random.normal(k_a2, (B2, action_dim), jnp.float32)
    out2 = quantile_q_forward(obs2, act2, prep_f32, block_b=128)
    jax.block_until_ready(out2)
    ref2 = _ref_forward(obs2, act2, params)
    assert out2.shape == (B2, n_quantiles)
    assert jnp.allclose(out2, ref2, atol=5e-2, rtol=5e-2), \
        float(jnp.max(jnp.abs(out2 - ref2)))

    # bf16 weights + in-kernel activation cast, f32 accumulate (default).
    prep_bf16 = prepare_params(params, obs_dim, action_dim)
    out_bf16 = quantile_q_forward(obs, action, prep_bf16)
    jax.block_until_ready(out_bf16)
    assert out_bf16.shape == (B, n_quantiles)
    assert jnp.allclose(out_bf16, ref, atol=2e-1, rtol=2e-1), \
        float(jnp.max(jnp.abs(out_bf16 - ref)))

    # 1-D action path (PyTorch's unsqueeze(-1) branch).
    k_p3, k_a3 = jax.random.split(k_rest)
    params1 = init_params(k_p3, obs_dim, 1, hidden_dim, n_quantiles)
    action1 = jax.random.normal(k_a3, (B,), jnp.float32)
    prep1 = prepare_params(params1, obs_dim, 1, compute_dtype=jnp.float32)
    out3 = quantile_q_forward(obs, action1, prep1)
    jax.block_until_ready(out3)
    ref3 = _ref_forward(obs, action1, params1)
    assert out3.shape == (B, n_quantiles)
    assert jnp.allclose(out3, ref3, atol=5e-2, rtol=5e-2), \
        float(jnp.max(jnp.abs(out3 - ref3)))

    print("KERNEL_OK")
</pallas_src>

<mosaic_0001>
module attributes {stable_mosaic.version = 11 : i64} {
  func.func @kernel(%arg0: i32, %arg1: memref<16x32xf32, #tpu.memory_space<vmem>>, %arg2: memref<16x4xf32, #tpu.memory_space<vmem>>, %arg3: memref<32x128xf32, #tpu.memory_space<vmem>>, %arg4: memref<4x128xf32, #tpu.memory_space<vmem>>, %arg5: memref<1x128xf32, #tpu.memory_space<vmem>>, %arg6: memref<128x128xf32, #tpu.memory_space<vmem>>, %arg7: memref<1x128xf32, #tpu.memory_space<vmem>>, %arg8: memref<128x16xf32, #tpu.memory_space<vmem>>, %arg9: memref<1x16xf32, #tpu.memory_space<vmem>>, %arg10: memref<16x16xf32, #tpu.memory_space<vmem>>) attributes {dimension_semantics = [#tpu.dimension_semantics<parallel>], iteration_bounds = array<i64: 1>, scalar_prefetch = 0 : i64, scratch_operands = 0 : i64, tpu.core_type = #tpu.core_type<tc>, window_params = [{transform_indices = @transform_0, window_bounds = array<i64: 16, 32>}, {transform_indices = @transform_1, window_bounds = array<i64: 16, 4>}, {pipeline_mode = #tpu.pipeline_mode<synchronous>, transform_indices = @transform_2, window_bounds = array<i64: 32, 128>}, {pipeline_mode = #tpu.pipeline_mode<synchronous>, transform_indices = @transform_3, window_bounds = array<i64: 4, 128>}, {pipeline_mode = #tpu.pipeline_mode<synchronous>, transform_indices = @transform_4, window_bounds = array<i64: 1, 128>}, {pipeline_mode = #tpu.pipeline_mode<synchronous>, transform_indices = @transform_5, window_bounds = array<i64: 128, 128>}, {pipeline_mode = #tpu.pipeline_mode<synchronous>, transform_indices = @transform_6, window_bounds = array<i64: 1, 128>}, {pipeline_mode = #tpu.pipeline_mode<synchronous>, transform_indices = @transform_7, window_bounds = array<i64: 128, 16>}, {pipeline_mode = #tpu.pipeline_mode<synchronous>, transform_indices = @transform_8, window_bounds = array<i64: 1, 16>}, {transform_indices = @transform_9, window_bounds = array<i64: 16, 16>}]} {
    %c0 = arith.constant 0 : index
    %c0_0 = arith.constant 0 : index
    %0 = vector.load %arg1[%c0, %c0_0] : memref<16x32xf32, #tpu.memory_space<vmem>>, vector<16x32xf32>
    %c0_1 = arith.constant 0 : index
    %c0_2 = arith.constant 0 : index
    %1 = vector.load %arg3[%c0_1, %c0_2] : memref<32x128xf32, #tpu.memory_space<vmem>>, vector<32x128xf32>
    %cst = arith.constant dense<0.000000e+00> : vector<16x128xf32>
    %2 = tpu.matmul %0, %1, %cst {dimension_numbers = #tpu.dot_dimension_numbers<[1], [0], [0], [1], [0, 0, 1, 1], [], []>} : vector<16x32xf32>, vector<32x128xf32>, vector<16x128xf32> -> vector<16x128xf32>
    %c0_3 = arith.constant 0 : index
    %c0_4 = arith.constant 0 : index
    %3 = vector.load %arg2[%c0_3, %c0_4] : memref<16x4xf32, #tpu.memory_space<vmem>>, vector<16x4xf32>
    %c0_5 = arith.constant 0 : index
    %c0_6 = arith.constant 0 : index
    %4 = vector.load %arg4[%c0_5, %c0_6] : memref<4x128xf32, #tpu.memory_space<vmem>>, vector<4x128xf32>
    %5 = vector.extract_strided_slice %3 {offsets = [0, 0], sizes = [16, 1], strides = [1, 1]} : vector<16x4xf32> to vector<16x1xf32>
    %6 = vector.extract_strided_slice %4 {offsets = [0, 0], sizes = [1, 128], strides = [1, 1]} : vector<4x128xf32> to vector<1x128xf32>
    %7 = vector.broadcast %5 : vector<16x1xf32> to vector<16x128xf32>
    %8 = vector.broadcast %6 : vector<1x128xf32> to vector<16x128xf32>
    %9 = arith.mulf %7, %8 : vector<16x128xf32>
    %10 = arith.addf %2, %9 : vector<16x128xf32>
    %11 = vector.extract_strided_slice %3 {offsets = [0, 1], sizes = [16, 1], strides = [1, 1]} : vector<16x4xf32> to vector<16x1xf32>
    %12 = vector.extract_strided_slice %4 {offsets = [1, 0], sizes = [1, 128], strides = [1, 1]} : vector<4x128xf32> to vector<1x128xf32>
    %13 = vector.broadcast %11 : vector<16x1xf32> to vector<16x128xf32>
    %14 = vector.broadcast %12 : vector<1x128xf32> to vector<16x128xf32>
    %15 = arith.mulf %13, %14 : vector<16x128xf32>
    %16 = arith.addf %10, %15 : vector<16x128xf32>
    %17 = vector.extract_strided_slice %3 {offsets = [0, 2], sizes = [16, 1], strides = [1, 1]} : vector<16x4xf32> to vector<16x1xf32>
    %18 = vector.extract_strided_slice %4 {offsets = [2, 0], sizes = [1, 128], strides = [1, 1]} : vector<4x128xf32> to vector<1x128xf32>
    %19 = vector.broadcast %17 : vector<16x1xf32> to vector<16x128xf32>
    %20 = vector.broadcast %18 : vector<1x128xf32> to vector<16x128xf32>
    %21 = arith.mulf %19, %20 : vector<16x128xf32>
    %22 = arith.addf %16, %21 : vector<16x128xf32>
    %23 = vector.extract_strided_slice %3 {offsets = [0, 3], sizes = [16, 1], strides = [1, 1]} : vector<16x4xf32> to vector<16x1xf32>
    %24 = vector.extract_strided_slice %4 {offsets = [3, 0], sizes = [1, 128], strides = [1, 1]} : vector<4x128xf32> to vector<1x128xf32>
    %25 = vector.broadcast %23 : vector<16x1xf32> to vector<16x128xf32>
    %26 = vector.broadcast %24 : vector<1x128xf32> to vector<16x128xf32>
    %27 = arith.mulf %25, %26 : vector<16x128xf32>
    %28 = arith.addf %22, %27 : vector<16x128xf32>
    %c0_7 = arith.constant 0 : index
    %c0_8 = arith.constant 0 : index
    %29 = vector.load %arg5[%c0_7, %c0_8] : memref<1x128xf32, #tpu.memory_space<vmem>>, vector<1x128xf32>
    %30 = vector.broadcast %29 : vector<1x128xf32> to vector<16x128xf32>
    %31 = arith.addf %28, %30 : vector<16x128xf32>
    %cst_9 = arith.constant 0.000000e+00 : f32
    %32 = vector.broadcast %cst_9 : f32 to vector<16x128xf32>
    %33 = arith.maximumf %31, %32 : vector<16x128xf32>
    %c0_10 = arith.constant 0 : index
    %c0_11 = arith.constant 0 : index
    %34 = vector.load %arg6[%c0_10, %c0_11] : memref<128x128xf32, #tpu.memory_space<vmem>>, vector<128x128xf32>
    %cst_12 = arith.constant dense<0.000000e+00> : vector<16x128xf32>
    %35 = tpu.matmul %33, %34, %cst_12 {dimension_numbers = #tpu.dot_dimension_numbers<[1], [0], [0], [1], [0, 0, 1, 1], [], []>} : vector<16x128xf32>, vector<128x128xf32>, vector<16x128xf32> -> vector<16x128xf32>
    %c0_13 = arith.constant 0 : index
    %c0_14 = arith.constant 0 : index
    %36 = vector.load %arg7[%c0_13, %c0_14] : memref<1x128xf32, #tpu.memory_space<vmem>>, vector<1x128xf32>
    %37 = vector.broadcast %36 : vector<1x128xf32> to vector<16x128xf32>
    %38 = arith.addf %35, %37 : vector<16x128xf32>
    %cst_15 = arith.constant 0.000000e+00 : f32
    %39 = vector.broadcast %cst_15 : f32 to vector<16x128xf32>
    %40 = arith.maximumf %38, %39 : vector<16x128xf32>
    %c0_16 = arith.constant 0 : index
    %c0_17 = arith.constant 0 : index
    %41 = vector.load %arg8[%c0_16, %c0_17] : memref<128x16xf32, #tpu.memory_space<vmem>>, vector<128x16xf32>
    %cst_18 = arith.constant dense<0.000000e+00> : vector<16x16xf32>
    %42 = tpu.matmul %40, %41, %cst_18 {dimension_numbers = #tpu.dot_dimension_numbers<[1], [0], [0], [1], [0, 0, 1, 1], [], []>} : vector<16x128xf32>, vector<128x16xf32>, vector<16x16xf32> -> vector<16x16xf32>
    %c0_19 = arith.constant 0 : index
    %c0_20 = arith.constant 0 : index
    %43 = vector.load %arg9[%c0_19, %c0_20] : memref<1x16xf32, #tpu.memory_space<vmem>>, vector<1x16xf32>
    %44 = vector.broadcast %43 : vector<1x16xf32> to vector<16x16xf32>
    %45 = arith.addf %42, %44 : vector<16x16xf32>
    %c0_21 = arith.constant 0 : index
    %c0_22 = arith.constant 0 : index
    %46 = vector.load %arg10[%c0_21, %c0_22] : memref<16x16xf32, #tpu.memory_space<vmem>>, vector<16x16xf32>
    tpu.vector_store %arg10[%c0_21, %c0_22], %45 {strides = array<i32>} : memref<16x16xf32, #tpu.memory_space<vmem>>, vector<16x16xf32>,
    return
  }
  func.func @transform_0(%arg0: i32) -> (i32, i32) {
    %c0_i32 = arith.constant 0 : i32
    %c0_i32_0 = arith.constant 0 : i32
    return %arg0, %c0_i32 : i32, i32
  }
  func.func @transform_1(%arg0: i32) -> (i32, i32) {
    %c0_i32 = arith.constant 0 : i32
    %c0_i32_0 = arith.constant 0 : i32
    return %arg0, %c0_i32 : i32, i32
  }
  func.func @transform_2(%arg0: i32) -> (i32, i32) {
    %c0_i32 = arith.constant 0 : i32
    %c0_i32_0 = arith.constant 0 : i32
    %c0_i32_1 = arith.constant 0 : i32
    return %c0_i32, %c0_i32_0 : i32, i32
  }
  func.func @transform_3(%arg0: i32) -> (i32, i32) {
    %c0_i32 = arith.constant 0 : i32
    %c0_i32_0 = arith.constant 0 : i32
    %c0_i32_1 = arith.constant 0 : i32
    return %c0_i32, %c0_i32_0 : i32, i32
  }
  func.func @transform_4(%arg0: i32) -> (i32, i32) {
    %c0_i32 = arith.constant 0 : i32
    %c0_i32_0 = arith.constant 0 : i32
    %c0_i32_1 = arith.constant 0 : i32
    return %c0_i32, %c0_i32_0 : i32, i32
  }
  func.func @transform_5(%arg0: i32) -> (i32, i32) {
    %c0_i32 = arith.constant 0 : i32
    %c0_i32_0 = arith.constant 0 : i32
    %c0_i32_1 = arith.constant 0 : i32
    return %c0_i32, %c0_i32_0 : i32, i32
  }
  func.func @transform_6(%arg0: i32) -> (i32, i32) {
    %c0_i32 = arith.constant 0 : i32
    %c0_i32_0 = arith.constant 0 : i32
    %c0_i32_1 = arith.constant 0 : i32
    return %c0_i32, %c0_i32_0 : i32, i32
  }
  func.func @transform_7(%arg0: i32) -> (i32, i32) {
    %c0_i32 = arith.constant 0 : i32
    %c0_i32_0 = arith.constant 0 : i32
    %c0_i32_1 = arith.constant 0 : i32
    return %c0_i32, %c0_i32_0 : i32, i32
  }
  func.func @transform_8(%arg0: i32) -> (i32, i32) {
    %c0_i32 = arith.constant 0 : i32
    %c0_i32_0 = arith.constant 0 : i32
    %c0_i32_1 = arith.constant 0 : i32
    return %c0_i32, %c0_i32_0 : i32, i32
  }
  func.func @transform_9(%arg0: i32) -> (i32, i32) {
    %c0_i32 = arith.constant 0 : i32
    %c0_i32_0 = arith.constant 0 : i32
    return %arg0, %c0_i32 : i32, i32
  }
}

</mosaic_0001>

<bundles_post_ra>
// kernel: tpu_custom_call.1
= control target key start
LH: loop header
LB: loop body
LE: loop exit
PB: predicated region body
PF: predicated region fallthrough
CT: control target
= control target key end

     0   :  { %14 = vsyncpa [#allocation3], 0  ;;  %s922_s0 = inlined_call_operand.hbm [shape: f32[16,32], index: 0, kind: input, shape index: {}]   ;;  %s923_s1 = inlined_call_operand.vmem [shape: f32[16,4], index: 1, kind: input, shape index: {}]   ;;  %s924_s2 = inlined_call_operand.vmem [shape: f32[32,128], index: 2, kind: input, shape index: {}]   ;;  %s925_s3 = inlined_call_operand.hbm [shape: f32[4,128], index: 3, kind: input, shape index: {}]   ;;  %s926_s4 = inlined_call_operand.hbm [shape: f32[1,128], index: 4, kind: input, shape index: {}]   ;;  %s927_s5 = inlined_call_operand.vmem [shape: f32[128,128], index: 5, kind: input, shape index: {}]   ;;  %s928_s6 = inlined_call_operand.hbm [shape: f32[1,128], index: 6, kind: input, shape index: {}]   ;;  %s929_s7 = inlined_call_operand.vmem [shape: f32[128,16], index: 7, kind: input, shape index: {}]   ;;  %s930_s8 = inlined_call_operand.vmem [shape: f32[1,16], index: 8, kind: input, shape index: {}]   ;;  %s931_s9 = inlined_call_operand.hbm [shape: f32[16,16], index: 9, kind: output, shape index: {}]  }
   0x1   :  { %15 = vsyncpa [#allocation6], 0 }
   0x2   :  { %16 = vsyncpa [#allocation9], 0 }
   0x3   :  { %17 = vsyncpa [#allocation4], 0  ;;  %s721_s30 = smov [#allocation5]   ;;  %s722_s11 = smov [#allocation2]  }
   0x4   :  { %s40_s10 = sshll.u32 %s721_s30, 4  ;;  %s23_s12 = sshll.u32 %s722_s11, 4  ;;  %s41_s10 = int_to_ptr.vmem [resolvable:$true] %s40_s10  ;;  %s24_s12 = int_to_ptr.vmem [resolvable:$true] %s23_s12 }
   0x5   :  { %s621_s13 = scalar_lea.vmem %s41_s10, 64  ;;  %p626_p1 = scmp.lt.s32.totalorder %s41_s10, %s41_s10 }
   0x6   :  { %p622_p0 = scmp.ne.s32.totalorder %s41_s10, %s621_s13  ;;  %p627_p2 = scmp.lt.s32.totalorder %s621_s13, %s621_s13 }
   0x8   :  { %p628_p3 = por %p627_p2, %p626_p1 }
   0xa   :  { %p629_p4 = pnand %p628_p3, %p622_p0 }
   0xc   :  { %632 = shalt.err (!%p629_p4)
}
   0xd   :  { %43 = dma.hbm_to_vmem [thread:$0]  %s925_s3, 64, %s41_s10, [#allocation6]  }
   0xe   :  { %s641_s16 = scalar_lea.vmem %s24_s12, 256  ;;  %p646_p6 = scmp.lt.s32.totalorder %s24_s12, %s24_s12 }
   0xf   :  { %p642_p5 = scmp.ne.s32.totalorder %s24_s12, %s641_s16  ;;  %p647_p7 = scmp.lt.s32.totalorder %s641_s16, %s641_s16 }
  0x11   :  { %p648_p8 = por %p647_p7, %p646_p6 }
  0x13   :  { %p649_p9 = pnand %p648_p8, %p642_p5 }
  0x15   :  { %652 = shalt.err (!%p649_p9)
}
  0x16   :  { %s723_s17 = smov 128   ;;  %s724_s18 = smov 8  }
  0x17   :  { %29 = dma.hbm_to_vmem [thread:$0]  %s922_s0, 256, %s24_s12, [#allocation3], %s723_s17, %s723_s17, %s724_s18  }
  0x18   :  { %s725_s21 = smov [#allocation7]   ;;  %s726_s23 = smov [#allocation8]  }
  0x19   :  { %s50_s22 = sshll.u32 %s725_s21, 4  ;;  %s62_s3 = sshll.u32 %s726_s23, 4  ;;  %s51_s22 = int_to_ptr.vmem [resolvable:$true] %s50_s22  ;;  %s63_s3 = int_to_ptr.vmem [resolvable:$true] %s62_s3 }
  0x1a   :  { %s661_s24 = scalar_lea.vmem %s51_s22, 16  ;;  %s665_s25 = scalar_lea.vmem %s51_s22, 32 }
  0x1b   :  { %p662_p10 = scmp.ne.s32.totalorder %s51_s22, %s661_s24  ;;  %p666_p11 = scmp.lt.s32.totalorder %s51_s22, %s51_s22 }
  0x1c   :  { %p667_p12 = scmp.lt.s32.totalorder %s665_s25, %s661_s24 }
  0x1e   :  { %p668_p13 = por %p667_p12, %p666_p11 }
  0x20   :  { %p669_p0 = pnand %p668_p13, %p662_p10 }
  0x22   :  { %672 = shalt.err (!%p669_p0)
}
  0x23   :  { %53 = dma.hbm_to_vmem [thread:$0]  %s926_s4, 16, %s51_s22, [#allocation6]  }
  0x24   :  { %s681_s28 = scalar_lea.vmem %s63_s3, 16  ;;  %s685_s0 = scalar_lea.vmem %s63_s3, 32 }
  0x25   :  { %p682_p1 = scmp.ne.s32.totalorder %s63_s3, %s681_s28  ;;  %p686_p2 = scmp.lt.s32.totalorder %s63_s3, %s63_s3 }
  0x26   :  { %p687_p3 = scmp.lt.s32.totalorder %s685_s0, %s681_s28 }
  0x28   :  { %p688_p4 = por %p687_p3, %p686_p2 }
  0x2a   :  { %p689_p5 = pnand %p688_p4, %p682_p1 }
  0x2c   :  { %692 = shalt.err (!%p689_p5)
}
  0x2d   :  { %65 = dma.hbm_to_vmem [thread:$0]  %s928_s6, 16, %s63_s3, [#allocation9]  }
  0x2e   :  { %713 = dma.done.wait [#allocation3], 256  }
  0x2f   :  { %714 = vsyncadd [#allocation3], 4294967040 }
  0x30   :  { %715 = dma.done.wait [#allocation6], 80  }
  0x31   :  { %716 = vsyncadd [#allocation6], 4294967216 }
  0x32   :  { %717 = dma.done.wait [#allocation9], 16  }
  0x33   :  { %718 = vsyncadd [#allocation9], 4294967280  ;;  %v727_v0 = vmov 1   ;;  %v728_v1 = vmov 0   ;;  %vm107_vm0 = vcmask 261120   ;;  %v87_v2 = vld [vmem:[%s924_s2 + $0x18] sm:$0xff]  ;;  %v101_v40 = vlaneseq }
  0x34   :  { %608 = vset.pattern.permute.xlu1 %v727_v0  ;;  %607 = vset.pattern.permute.xlu0 %v728_v1  ;;  %v86_v3 = vld [vmem:[%s924_s2 + $0x10] sm:$0xff]  ;;  %v82_v4 = vld [vmem:[#allocation2] sm:$0xff]  ;;  %v85_v5 = vld [vmem:[%s924_s2 + $0x8] sm:$0xff]  ;;  %v729_v13 = vmov 2   ;;  %v730_v16 = vmov 3   ;;  %vm446_vm1 = vcmask 130048  }
  0x35   :  { %515 = vmatprep.subr.mxu0 %v87_v2  ;;  %523 = vmatprep.mubr.msk.f32.mxu0 %vm107_vm0, %v82_v4  ;;  %v88_v6 = vld [vmem:[%s923_s1] sm:$0xff]  ;;  %v263_v7 = vld [vmem:[%s927_s5 + $0x78] sm:$0xff]  ;;  %v89_v9 = vld [vmem:[%s923_s1 + $0x8] sm:$0xff]  ;;  %v102_v43 = vshrl.u32 %v101_v40, 7  ;;  %s731_s10 = smov [#allocation10]  }
  0x36   :  { %516 = vmatpush3.msra.mxu0 %v87_v2  ;;  %190 = vperm.xlu1 %608, %v88_v6   ;;  %v84_v8 = vld [vmem:[%s924_s2] sm:$0xff]  ;;  %v83_v10 = vld [vmem:[#allocation2 + $0x8] sm:$0xff]  ;;  %v262_v11 = vld [vmem:[%s927_s5 + $0x70] sm:$0xff]  ;;  %s454_s11 = sshll.u32 %s731_s10, 4  ;;  %s455_s11 = int_to_ptr.vmem [resolvable:$true] %s454_s11 }
  0x37   :  { %517 = vmatprep.subr.mxu0 %v86_v3  ;;  %93 = vperm.xlu0 %607, %v88_v6   ;;  %v261_v12 = vld [vmem:[%s927_s5 + $0x68] sm:$0xff]  ;;  %v260_v14 = vld [vmem:[%s927_s5 + $0x60] sm:$0xff]  ;;  %v259_v15 = vld [vmem:[%s927_s5 + $0x58] sm:$0xff]  ;;  %v103_v45 = vsub.s32 0, %v102_v43  ;;  %v199_v48 = vsub.s32 1, %v102_v43  ;;  %v215_v49 = vsub.s32 2, %v102_v43  ;;  %p698_p7 = scmp.lt.s32.totalorder %s455_s11, %s455_s11 }
  0x38   :  { %518 = vmatpush3.msra.mxu0 %v86_v3  ;;  %526 = vmatprep.subr.mxu1 %v263_v7  ;;  %v258_v17 = vld [vmem:[%s927_s5 + $0x50] sm:$0xff]  ;;  %v257_v18 = vld [vmem:[%s927_s5 + $0x48] sm:$0xff]  ;;  %v256_v19 = vld [vmem:[%s927_s5 + $0x40] sm:$0xff]  ;;  %v231_v52 = vsub.s32 3, %v102_v43 }
  0x39   :  { %519 = vmatprep.subr.mxu0 %v85_v5  ;;  %527 = vmatpush3.msra.mxu1 %v263_v7  ;;  %v255_v20 = vld [vmem:[%s927_s5 + $0x38] sm:$0xff]  ;;  %v254_v21 = vld [vmem:[%s927_s5 + $0x30] sm:$0xff]  ;;  %v253_v22 = vld [vmem:[%s927_s5 + $0x28] sm:$0xff] }
  0x3a   :  { %520 = vmatpush3.msra.mxu0 %v85_v5  ;;  %194 = vperm.xlu1 %608, %v89_v9   ;;  %v252_v23 = vld [vmem:[%s927_s5 + $0x20] sm:$0xff]  ;;  %v251_v24 = vld [vmem:[%s927_s5 + $0x18] sm:$0xff]  ;;  %v250_v25 = vld [vmem:[%s927_s5 + $0x10] sm:$0xff] }
  0x3b   :  { %521 = vmatprep.subr.mxu0 %v84_v8  ;;  %98 = vperm.xlu0 %607, %v89_v9   ;;  %v249_v26 = vld [vmem:[%s927_s5 + $0x8] sm:$0xff]  ;;  %v248_v27 = vld [vmem:[%s927_s5] sm:$0xff]  ;;  %v363_v28 = vld [vmem:[%s929_s7 + $0x78] sm:$0xff] }
  0x3c   :  { %522 = vmatpush3.msra.mxu0 %v84_v8  ;;  %528 = vmatprep.subr.mxu1 %v262_v11  ;;  %v362_v29 = vld [vmem:[%s929_s7 + $0x70] sm:$0xff]  ;;  %v361_v30 = vld [vmem:[%s929_s7 + $0x68] sm:$0xff]  ;;  %v360_v31 = vld [vmem:[%s929_s7 + $0x60] sm:$0xff] }
  0x3d   :  { %524 = vmatmul.mubr.msk.f32.vlgmr.msra.gmra.mxu0 %vm107_vm0, %v83_v10  ;;  %529 = vmatpush3.msra.mxu1 %v262_v11  ;;  %v359_v32 = vld [vmem:[%s929_s7 + $0x58] sm:$0xff]  ;;  %v358_v33 = vld [vmem:[%s929_s7 + $0x50] sm:$0xff]  ;;  %v357_v34 = vld [vmem:[%s929_s7 + $0x48] sm:$0xff] }
  0x3e   :  { %610 = vset.pattern.permute.xlu1 %v729_v13  ;;  %530 = vmatprep.subr.mxu1 %v261_v12  ;;  %v356_v35 = vld [vmem:[%s929_s7 + $0x40] sm:$0xff]  ;;  %v355_v36 = vld [vmem:[%s929_s7 + $0x38] sm:$0xff]  ;;  %v354_v37 = vld [vmem:[%s929_s7 + $0x30] sm:$0xff] }
  0x3f   :  { %609 = vset.pattern.permute.xlu0 %v729_v13  ;;  %210 = vperm.xlu1 %610, %v89_v9   ;;  %v353_v38 = vld [vmem:[%s929_s7 + $0x28] sm:$0xff]  ;;  %v352_v39 = vld [vmem:[%s929_s7 + $0x20] sm:$0xff]  ;;  %v90_v46 = vld [vmem:[#allocation5] sm:$0xf] }
  0x40   :  { %206 = vperm.xlu0 %609, %v88_v6   ;;  %531 = vmatpush3.msra.mxu1 %v261_v12  ;;  %v104_v51 = vrot.slane %v90_v46, %v103_v45  ;;  %v200_v54 = vrot.slane %v90_v46, %v199_v48  ;;  %v216_v55 = vrot.slane %v90_v46, %v215_v49  ;;  %v470_v12 = vld [vmem:[#allocation7] ss:$0 sm:$0xff] }
  0x41   :  { %532 = vmatprep.subr.mxu1 %v260_v14  ;;  %561 = vmatprep.subr.mxu0 %v363_v28  ;;  %v232_v57 = vrot.slane %v90_v46, %v231_v52 }
  0x42   :  { %533 = vmatpush3.msra.mxu1 %v260_v14  ;;  %562 = vmatpush3.msra.mxu0 %v363_v28 }
  0x43   :  { %611 = vset.pattern.permute.xlu1 %v730_v16  ;;  %534 = vmatprep.subr.mxu1 %v259_v15 }
  0x44   :  { %612 = vset.pattern.permute.xlu0 %v730_v16  ;;  %222 = vperm.xlu1 %611, %v88_v6  }
  0x45   :  { %226 = vperm.xlu0 %612, %v89_v9   ;;  %535 = vmatpush3.msra.mxu1 %v259_v15 }
  0x46   :  { %536 = vmatprep.subr.mxu1 %v258_v17  ;;  %563 = vmatprep.subr.mxu0 %v362_v29 }
  0x47   :  { %537 = vmatpush3.msra.mxu1 %v258_v17  ;;  %564 = vmatpush3.msra.mxu0 %v362_v29  ;;  %v472_v29 = vld [vmem:[%s930_s8] ss:$0 sm:$0xff] }
  0x48   :  { %538 = vmatprep.subr.mxu1 %v257_v18  ;;  %565 = vmatprep.subr.mxu0 %v361_v30 }
  0x49   :  { %539 = vmatpush3.msra.mxu1 %v257_v18  ;;  %566 = vmatpush3.msra.mxu0 %v361_v30  ;;  %v351_v18 = vld [vmem:[%s929_s7 + $0x18] sm:$0xff] }
  0x4a   :  { %540 = vmatprep.subr.mxu1 %v256_v19  ;;  %567 = vmatprep.subr.mxu0 %v360_v31 }
  0x4b   :  { %541 = vmatpush3.msra.mxu1 %v256_v19  ;;  %568 = vmatpush3.msra.mxu0 %v360_v31  ;;  %v350_v19 = vld [vmem:[%s929_s7 + $0x10] sm:$0xff] }
  0x4c   :  { %542 = vmatprep.subr.mxu1 %v255_v20  ;;  %569 = vmatprep.subr.mxu0 %v359_v32 }
  0x4d   :  { %543 = vmatpush3.msra.mxu1 %v255_v20  ;;  %570 = vmatpush3.msra.mxu0 %v359_v32  ;;  %v349_v20 = vld [vmem:[%s929_s7 + $0x8] sm:$0xff] }
  0x4e   :  { %544 = vmatprep.subr.mxu1 %v254_v21  ;;  %571 = vmatprep.subr.mxu0 %v358_v33 }
  0x4f   :  { %545 = vmatpush3.msra.mxu1 %v254_v21  ;;  %572 = vmatpush3.msra.mxu0 %v358_v33  ;;  %v348_v21 = vld [vmem:[%s929_s7] sm:$0xff]  ;;  %s693_s7 = scalar_lea.vmem %s455_s11, 256 }
  0x50   :  { %546 = vmatprep.subr.mxu1 %v253_v22  ;;  %573 = vmatprep.subr.mxu0 %v357_v34  ;;  %p694_p6 = scmp.ne.s32.totalorder %s455_s11, %s693_s7  ;;  %p699_p8 = scmp.lt.s32.totalorder %s693_s7, %s693_s7 }
  0x51   :  { %547 = vmatpush3.msra.mxu1 %v253_v22  ;;  %574 = vmatpush3.msra.mxu0 %v357_v34  ;;  %v471_v22 = vld [vmem:[#allocation8] ss:$0 sm:$0xff] }
  0x52   :  { %548 = vmatprep.subr.mxu1 %v252_v23  ;;  %575 = vmatprep.subr.mxu0 %v356_v35  ;;  %p700_p9 = por %p699_p8, %p698_p7 }
  0x53   :  { %549 = vmatpush3.msra.mxu1 %v252_v23  ;;  %576 = vmatpush3.msra.mxu0 %v356_v35 }
  0x54   :  { %550 = vmatprep.subr.mxu1 %v251_v24  ;;  %577 = vmatprep.subr.mxu0 %v355_v36  ;;  %p701_p10 = pnand %p700_p9, %p694_p6 }
  0x55   :  { %551 = vmatpush3.msra.mxu1 %v251_v24  ;;  %578 = vmatpush3.msra.mxu0 %v355_v36 }
  0x56   :  { %552 = vmatprep.subr.mxu1 %v250_v25  ;;  %579 = vmatprep.subr.mxu0 %v354_v37 }
  0x57   :  { %553 = vmatpush3.msra.mxu1 %v250_v25  ;;  %580 = vmatpush3.msra.mxu0 %v354_v37 }
  0x58   :  { %554 = vmatprep.subr.mxu1 %v249_v26  ;;  %581 = vmatprep.subr.mxu0 %v353_v38 }
  0x59   :  { %555 = vmatpush3.msra.mxu1 %v249_v26  ;;  %582 = vmatpush3.msra.mxu0 %v353_v38 }
  0x5a   :  { %556 = vmatprep.subr.mxu1 %v248_v27  ;;  %583 = vmatprep.subr.mxu0 %v352_v39 }
  0x5b   :  { %557 = vmatpush3.msra.mxu1 %v248_v27  ;;  %584 = vmatpush3.msra.mxu0 %v352_v39 }
  0x5c   :  { %585 = vmatprep.subr.mxu0 %v351_v18 }
  0x5d   :  { %586 = vmatpush3.msra.mxu0 %v351_v18 }
  0x5e   :  { %587 = vmatprep.subr.mxu0 %v350_v19 }
  0x5f   :  { %588 = vmatpush3.msra.mxu0 %v350_v19 }
  0x60   :  { %589 = vmatprep.subr.mxu0 %v349_v20 }
  0x61   :  { %590 = vmatpush3.msra.mxu0 %v349_v20 }
  0x62   :  { %591 = vmatprep.subr.mxu0 %v348_v21 }
  0x63   :  { %592 = vmatpush3.msra.mxu0 %v348_v21 }
  0xb1   :  { %v191_v42 = vpop.permute.xlu1 %190 }
  0xb2   :  { %v94_v41 = vpop.permute.xlu0 %93  ;;  %v201_v2 = vmul.f32 %v200_v54, %v191_v42 }
  0xb3   :  { %v105_v60 = vmul.f32 %v104_v51, %v94_v41 }
  0xb5   :  { %v195_v47 = vpop.permute.xlu1 %194 }
  0xb6   :  { %v99_v44 = vpop.permute.xlu0 %98  ;;  %v202_v61 = vmul.f32 %v200_v54, %v195_v47 }
  0xb7   :  { %v106_v56 = vmul.f32 %v104_v51, %v99_v44 }
  0xba   :  { %v211_v53 = vpop.permute.xlu1 %210 }
  0xbb   :  { %v207_v50 = vpop.permute.xlu0 %206  ;;  %v218_v63 = vmul.f32 %v216_v55, %v211_v53 }
  0xbc   :  { %v217_v6 = vmul.f32 %v216_v55, %v207_v50 }
  0xbf   :  { %v223_v1 = vpop.permute.xlu1 %222 }
  0xc0   :  { %v227_v59 = vpop.permute.xlu0 %226  ;;  %v233_v9 = vmul.f32 %v232_v57, %v223_v1 }
  0xc1   :  { %v234_v5 = vmul.f32 %v232_v57, %v227_v59 }
  0xfd   :  { %v525_v58 = vpop.f32.mrf.mxu0 }
  0xfe   :  { %v186_v62 = vadd.f32 %v525_v58, %v106_v56 }
  0xff   :  { %v180_v0 = vpop.f32.mrf.mxu0 }
 0x100   :  { %v204_v3 = vadd.f32 %v202_v61, %v186_v62  ;;  %v181_v4 = vadd.f32 %v180_v0, %v105_v60 }
 0x102   :  { %v220_v7 = vadd.f32 %v218_v63, %v204_v3  ;;  %v203_v8 = vadd.f32 %v201_v2, %v181_v4 }
 0x104   :  { %v236_v10 = vadd.f32 %v234_v5, %v220_v7  ;;  %v219_v11 = vadd.f32 %v217_v6, %v203_v8 }
 0x106   :  { %v235_v13 = vadd.f32 %v233_v9, %v219_v11  ;;  %v245_v14 = vadd.f32 %v470_v12, %v236_v10 }
 0x108   :  { %v244_v15 = vadd.f32 %v470_v12, %v235_v13  ;;  %v247_v17 = vmax.f32 %v245_v14, 0.0 }
 0x10a   :  { %v246_v16 = vmax.f32 %v244_v15, 0.0 }
 0x10c   :  { %558 = vmatprep.mubr.f32.mxu1 %v246_v16 }
 0x10d   :  { %559 = vmatmul.mubr.f32.vlgmr.msra.gmra.mxu1 %v247_v17 }
 0x1cd   :  { %v560_v23 = vpop.f32.mrf.mxu1 }
 0x1ce   :  { %v343_v24 = vadd.f32 %v560_v23, %v471_v22 }
 0x1cf   :  { %v337_v25 = vpop.f32.mrf.mxu1 }
 0x1d0   :  { %v338_v26 = vadd.f32 %v471_v22, %v337_v25  ;;  %v347_v28 = vmax.f32 %v343_v24, 0.0 }
 0x1d2   :  { %v346_v27 = vmax.f32 %v338_v26, 0.0 }
 0x1d4   :  { %593 = vmatprep.mubr.f32.mxu0 %v346_v27 }
 0x1d5   :  { %594 = vmatmul.mubr.f32.vlgmr.msra.gmra.mxu0 %v347_v28 }
 0x295   :  { %v595_v30 = vpop.f32.mrf.mxu0 }
 0x296   :  { %v443_v31 = vadd.f32 %v595_v30, %v472_v29 }
 0x297   :  { %v437_v32 = vpop.f32.mrf.mxu0 }
 0x298   :  { %v438_v33 = vadd.f32 %v472_v29, %v437_v32  ;;  %448 = vst.msk [vmem:[#allocation10 + $0x8] sm:$0xff] %vm446_vm1, %v443_v31 }
 0x29a   :  { %447 = vst.msk [vmem:[#allocation10] sm:$0xff] %vm446_vm1, %v438_v33 }
 0x29b   :  { %704 = shalt.err (!%p701_p10)
}
 0x29c   :  { %460 = dma.vmem_to_hbm [thread:$0]  %s455_s11, 256, %s931_s9, [#allocation4], %s723_s17, %s723_s17, %s724_s18  }
 0x29d   :  { %719 = dma.done.wait [#allocation4], 256  }
 0x29e   :  { %720 = vsyncadd [#allocation4], 4294967040 }
 0x29f   :  { %464 = vsyncpa [#allocation3], 1 }
 0x2a0   :  { %465 = vsyncpa [#allocation6], 1 }
 0x2a1   :  { %466 = vsyncpa [#allocation9], 1 }
 0x2a2   :  { %467 = vsyncpa [#allocation4], 1 }

</bundles_post_ra>
